<compile_context>
chip_gen: v5e
topology: v5e:2x2
jax: 0.10.0
libtpu: 0.0.40
codegen_flags: <defaults>
</compile_context>

<pallas_src>
import math
from functools import partial

import jax
import jax.numpy as jnp
from jax.experimental import pallas as pl
from jax.experimental.pallas import tpu as pltpu

LN_EPS = 1e-5  # nn.LayerNorm default


def _gelu_ln_kernel(x_ref, g_ref, b_ref, o_ref, *, bf16_post):
    """x_ref: (TR, H) row tile; g_ref/b_ref: (1, H) affine params; o_ref: (TR, H)."""
    x = x_ref[...].astype(jnp.float32)
    inv_h = jnp.float32(1.0 / x.shape[-1])

    # Two-pass moments over the VMEM-resident tile (data already in vregs):
    # numerically robust vs E[x^2] - mean^2 cancellation, f32 accumulation.
    mean = jnp.sum(x, axis=-1, keepdims=True) * inv_h
    xc = x - mean
    var = jnp.sum(xc * xc, axis=-1, keepdims=True) * inv_h
    inv_std = jax.lax.rsqrt(var + jnp.float32(LN_EPS))   # (TR, 1)

    xn = xc * inv_std                                    # (TR, H) normalized, f32

    # Post-normalization math: bf16 on chips with native bf16 VALU/EUP when the
    # IO dtype is bf16 (halves VPU pressure), f32 otherwise.
    if bf16_post:
        xn = xn.astype(jnp.bfloat16)
        g = g_ref[...].astype(jnp.bfloat16)
        b = b_ref[...].astype(jnp.bfloat16)
    else:
        g = g_ref[...].astype(jnp.float32)
        b = b_ref[...].astype(jnp.float32)

    # Regrouped affine: every broadcast is against an already-live (TR,H) operand.
    y = xn * g + b

    # tanh-approximate GELU (exactly the formula in the PyTorch forward):
    # 0.5*y*(1 + tanh(sqrt(2/pi)*(y + 0.044715*y^3)))
    c = math.sqrt(2.0 / math.pi)
    o = 0.5 * y * (1.0 + jnp.tanh(c * (y + 0.044715 * (y * y * y))))

    o_ref[...] = o.astype(o_ref.dtype)


def _vmem_capacity_bytes():
    """Per-TensorCore VMEM; conservative fallback if the query fails."""
    cap = None
    try:
        info = pltpu.get_tpu_info()
        for attr in ("vmem_capacity_bytes", "vmem_size_bytes", "vmem_bytes"):
            v = getattr(info, attr, None)
            if v:
                cap = int(v)
                break
    except Exception:
        cap = None
    if cap is None:
        cap = 64 * 1024 * 1024
    # v7x has 2 TCs sharing the chip with 64 MiB VMEM each; a per-chip 128 MiB
    # figure would oversubscribe when the "parallel" axis shards across TCs.
    try:
        kind = jax.devices()[0].device_kind.lower()
        if "v7" in kind:
            cap = min(cap, 64 * 1024 * 1024)
    except Exception:
        cap = min(cap, 64 * 1024 * 1024)
    return cap


def _bf16_post_math_ok():
    """bf16 post-norm math only on chips with native bf16 VALU/EUP (not v5)."""
    try:
        kind = jax.devices()[0].device_kind.lower()
        return "v5" not in kind
    except Exception:
        return False


def _sublane_align(dtype):
    """Row-tile alignment so packed sub-32-bit dtypes stay unmasked (8/16/32)."""
    itemsize = jnp.dtype(dtype).itemsize
    if itemsize >= 4:
        return 8
    if itemsize == 2:
        return 16
    return 32


def _pick_row_tile(rows, h, io_dtype, vmem_cap):
    io_b = jnp.dtype(io_dtype).itemsize
    align = _sublane_align(io_dtype)

    if rows <= align:
        # Single block equal to the full row extent (always a legal block shape).
        return rows

    # Per-row VMEM footprint: double-buffered input + output tiles in the IO
    # dtype PLUS ~3 full-width f32 temporaries live inside the kernel
    # (x upcast, centred/normalised x, GELU intermediate).
    per_row = 2 * h * io_b + 2 * h * io_b + 3 * h * 4
    budget = vmem_cap // 2            # headroom for params, scratch, regalloc
    tr = (budget // per_row) // align * align
    tr = max(align, min(tr, 512))     # roofline saturates ~85% by 512 rows

    # Keep >= ~4 grid steps so DMA/compute overlap and both v7x TCs get work.
    min_steps = 4
    tr_steps = max(align, ((rows + min_steps - 1) // min_steps) // align * align)
    tr = min(tr, tr_steps)

    tr = min(tr, (rows // align) * align)   # keep the block within the array
    return max(align, tr)


def gelu_with_layernorm(x, gamma, beta):
    """LayerNorm over the last dim followed by tanh-approx GELU.

    x: (..., H); gamma, beta: (H,). Returns the same shape/dtype as x.
    """
    orig_shape = x.shape
    h = orig_shape[-1]
    rows = 1
    for d in orig_shape[:-1]:
        rows *= d

    x2 = x.reshape(rows, h)          # contiguous view, no HBM traffic
    g2 = gamma.reshape(1, h)
    b2 = beta.reshape(1, h)

    vmem_cap = _vmem_capacity_bytes()
    tr = _pick_row_tile(rows, h, x.dtype, vmem_cap)
    grid = (pl.cdiv(rows, tr),)      # ragged last block: OOB rows masked on writeback

    io_b = jnp.dtype(x.dtype).itemsize
    param_b = jnp.dtype(gamma.dtype).itemsize
    # Declared VMEM: double-buffered IO tiles + in-kernel f32 temps + params.
    footprint = (2 * tr * h * io_b          # input double buffer
                 + 2 * tr * h * io_b        # output double buffer
                 + 3 * tr * h * 4           # f32 temporaries inside the kernel
                 + 2 * 2 * h * param_b)     # gamma/beta, double-buffered
    vmem_limit = int(min(max(footprint + (4 << 20), 16 << 20), vmem_cap))

    bf16_post = (x.dtype == jnp.bfloat16) and _bf16_post_math_ok()

    cost = pl.CostEstimate(
        flops=15 * rows * h,
        transcendentals=rows * h,
        bytes_accessed=2 * rows * h * io_b + 2 * h * param_b,
    )

    # TODO(synk): for H < 128 the stores are lane-masked; a lane-folding variant
    # (several rows folded into the lane axis + segmented reduction) would be
    # needed to make tiny-H cases store-dense.
    out = pl.pallas_call(
        partial(_gelu_ln_kernel, bf16_post=bf16_post),
        out_shape=jax.ShapeDtypeStruct((rows, h), x.dtype),
        grid_spec=pltpu.PrefetchScalarGridSpec(
            num_scalar_prefetch=0,
            grid=grid,
            in_specs=[
                pl.BlockSpec((tr, h), lambda i: (i, 0)),
                pl.BlockSpec((1, h), lambda i: (0, 0)),
                pl.BlockSpec((1, h), lambda i: (0, 0)),
            ],
            out_specs=pl.BlockSpec((tr, h), lambda i: (i, 0)),
        ),
        compiler_params=pltpu.CompilerParams(
            # Row grid shards across the two TensorCores on v7x megacore.
            dimension_semantics=("parallel",),
            vmem_limit_bytes=vmem_limit,
        ),
        cost_estimate=cost,
    )(x2, g2, b2)

    return out.reshape(orig_shape)


def _reference(x, gamma, beta):
    x32 = x.astype(jnp.float32)
    mean = jnp.mean(x32, axis=-1, keepdims=True)
    var = jnp.mean((x32 - mean) ** 2, axis=-1, keepdims=True)
    y = (x32 - mean) * jax.lax.rsqrt(var + LN_EPS) * gamma.astype(jnp.float32) \
        + beta.astype(jnp.float32)
    c = math.sqrt(2.0 / math.pi)
    return 0.5 * y * (1.0 + jnp.tanh(c * (y + 0.044715 * y ** 3)))


if __name__ == "__main__":
    key = jax.random.PRNGKey(0)
    kx, kg, kb, kx2, kx3 = jax.random.split(key, 5)

    # Small shapes consistent with the module: (batch, seq, hidden).
    batch, seq, hidden = 2, 8, 32
    x = jax.random.normal(kx, (batch, seq, hidden), dtype=jnp.float32)
    gamma = 1.0 + 0.1 * jax.random.normal(kg, (hidden,), dtype=jnp.float32)
    beta = 0.05 * jax.random.normal(kb, (hidden,), dtype=jnp.float32)

    out = jax.block_until_ready(gelu_with_layernorm(x, gamma, beta))
    ref = _reference(x, gamma, beta)
    assert out.shape == x.shape and out.dtype == x.dtype
    assert float(jnp.max(jnp.abs(out.astype(jnp.float32) - ref))) < 1e-4, \
        "mismatch vs reference"

    # Ragged row count (rows % tile != 0) exercises the masked-writeback path;
    # H=256 is lane-dense.
    b2_, s2_, h2_ = 2, 13, 256
    xr = jax.random.normal(kx2, (b2_, s2_, h2_), dtype=jnp.float32)
    gr = jnp.ones((h2_,), dtype=jnp.float32)
    br = jnp.zeros((h2_,), dtype=jnp.float32)
    outr = jax.block_until_ready(gelu_with_layernorm(xr, gr, br))
    refr = _reference(xr, gr, br)
    assert float(jnp.max(jnp.abs(outr.astype(jnp.float32) - refr))) < 1e-4, \
        "mismatch vs reference (ragged)"

    # bf16 IO exercises the bf16 post-norm math path on v6e/v7x (f32 on v5e).
    b3_, s3_, h3_ = 4, 7, 128
    xb = jax.random.normal(kx3, (b3_, s3_, h3_), dtype=jnp.float32).astype(jnp.bfloat16)
    gb = jnp.ones((h3_,), dtype=jnp.bfloat16)
    bb = jnp.zeros((h3_,), dtype=jnp.bfloat16)
    outb = jax.block_until_ready(gelu_with_layernorm(xb, gb, bb))
    refb = _reference(xb, gb, bb)
    assert outb.dtype == jnp.bfloat16
    assert float(jnp.max(jnp.abs(outb.astype(jnp.float32) - refb))) < 3e-2, \
        "mismatch vs reference (bf16)"

    print("KERNEL_OK")
</pallas_src>

<mosaic_0001>
module attributes {stable_mosaic.version = 11 : i64} {
  func.func @_gelu_ln_kernel(%arg0: i32, %arg1: memref<8x32xf32, #tpu.memory_space<vmem>>, %arg2: memref<1x32xf32, #tpu.memory_space<vmem>>, %arg3: memref<1x32xf32, #tpu.memory_space<vmem>>, %arg4: memref<8x32xf32, #tpu.memory_space<vmem>>) attributes {dimension_semantics = [#tpu.dimension_semantics<parallel>], iteration_bounds = array<i64: 2>, scalar_prefetch = 0 : i64, scratch_operands = 0 : i64, tpu.core_type = #tpu.core_type<tc>, window_params = [{transform_indices = @transform_0, window_bounds = array<i64: 8, 32>}, {pipeline_mode = #tpu.pipeline_mode<synchronous>, transform_indices = @transform_1, window_bounds = array<i64: 1, 32>}, {pipeline_mode = #tpu.pipeline_mode<synchronous>, transform_indices = @transform_2, window_bounds = array<i64: 1, 32>}, {transform_indices = @transform_3, window_bounds = array<i64: 8, 32>}]} {
    %c0 = arith.constant 0 : index
    %c0_0 = arith.constant 0 : index
    %0 = vector.load %arg1[%c0, %c0_0] : memref<8x32xf32, #tpu.memory_space<vmem>>, vector<8x32xf32>
    %cst = arith.constant dense<0.000000e+00> : vector<8xf32>
    %1 = vector.multi_reduction <add>, %0, %cst [1] : vector<8x32xf32> to vector<8xf32>
    %2 = vector.shape_cast %1 : vector<8xf32> to vector<8x1xf32>
    %cst_1 = arith.constant 3.125000e-02 : f32
    %3 = vector.broadcast %cst_1 : f32 to vector<8x1xf32>
    %4 = arith.mulf %2, %3 : vector<8x1xf32>
    %5 = vector.broadcast %4 : vector<8x1xf32> to vector<8x32xf32>
    %6 = arith.subf %0, %5 : vector<8x32xf32>
    %7 = arith.mulf %6, %6 : vector<8x32xf32>
    %cst_2 = arith.constant dense<0.000000e+00> : vector<8xf32>
    %8 = vector.multi_reduction <add>, %7, %cst_2 [1] : vector<8x32xf32> to vector<8xf32>
    %9 = vector.shape_cast %8 : vector<8xf32> to vector<8x1xf32>
    %cst_3 = arith.constant 3.125000e-02 : f32
    %10 = vector.broadcast %cst_3 : f32 to vector<8x1xf32>
    %11 = arith.mulf %9, %10 : vector<8x1xf32>
    %cst_4 = arith.constant 9.99999974E-6 : f32
    %12 = vector.broadcast %cst_4 : f32 to vector<8x1xf32>
    %13 = arith.addf %11, %12 : vector<8x1xf32>
    %14 = math.rsqrt %13 : vector<8x1xf32>
    %15 = vector.broadcast %14 : vector<8x1xf32> to vector<8x32xf32>
    %16 = arith.mulf %6, %15 : vector<8x32xf32>
    %c0_5 = arith.constant 0 : index
    %c0_6 = arith.constant 0 : index
    %17 = vector.load %arg2[%c0_5, %c0_6] : memref<1x32xf32, #tpu.memory_space<vmem>>, vector<1x32xf32>
    %c0_7 = arith.constant 0 : index
    %c0_8 = arith.constant 0 : index
    %18 = vector.load %arg3[%c0_7, %c0_8] : memref<1x32xf32, #tpu.memory_space<vmem>>, vector<1x32xf32>
    %19 = vector.broadcast %17 : vector<1x32xf32> to vector<8x32xf32>
    %20 = arith.mulf %16, %19 : vector<8x32xf32>
    %21 = vector.broadcast %18 : vector<1x32xf32> to vector<8x32xf32>
    %22 = arith.addf %20, %21 : vector<8x32xf32>
    %cst_9 = arith.constant 5.000000e-01 : f32
    %23 = vector.broadcast %cst_9 : f32 to vector<8x32xf32>
    %24 = arith.mulf %23, %22 : vector<8x32xf32>
    %25 = arith.mulf %22, %22 : vector<8x32xf32>
    %26 = arith.mulf %25, %22 : vector<8x32xf32>
    %cst_10 = arith.constant 4.471500e-02 : f32
    %27 = vector.broadcast %cst_10 : f32 to vector<8x32xf32>
    %28 = arith.mulf %27, %26 : vector<8x32xf32>
    %29 = arith.addf %22, %28 : vector<8x32xf32>
    %cst_11 = arith.constant 0.797884583 : f32
    %30 = vector.broadcast %cst_11 : f32 to vector<8x32xf32>
    %31 = arith.mulf %30, %29 : vector<8x32xf32>
    %32 = math.tanh %31 : vector<8x32xf32>
    %cst_12 = arith.constant 1.000000e+00 : f32
    %33 = vector.broadcast %cst_12 : f32 to vector<8x32xf32>
    %34 = arith.addf %33, %32 : vector<8x32xf32>
    %35 = arith.mulf %24, %34 : vector<8x32xf32>
    %c0_13 = arith.constant 0 : index
    %c0_14 = arith.constant 0 : index
    %36 = vector.load %arg4[%c0_13, %c0_14] : memref<8x32xf32, #tpu.memory_space<vmem>>, vector<8x32xf32>
    tpu.vector_store %arg4[%c0_13, %c0_14], %35 {strides = array<i32>} : memref<8x32xf32, #tpu.memory_space<vmem>>, vector<8x32xf32>,
    return
  }
  func.func @transform_0(%arg0: i32) -> (i32, i32) {
    %c0_i32 = arith.constant 0 : i32
    %c0_i32_0 = arith.constant 0 : i32
    return %arg0, %c0_i32 : i32, i32
  }
  func.func @transform_1(%arg0: i32) -> (i32, i32) {
    %c0_i32 = arith.constant 0 : i32
    %c0_i32_0 = arith.constant 0 : i32
    %c0_i32_1 = arith.constant 0 : i32
    return %c0_i32, %c0_i32_0 : i32, i32
  }
  func.func @transform_2(%arg0: i32) -> (i32, i32) {
    %c0_i32 = arith.constant 0 : i32
    %c0_i32_0 = arith.constant 0 : i32
    %c0_i32_1 = arith.constant 0 : i32
    return %c0_i32, %c0_i32_0 : i32, i32
  }
  func.func @transform_3(%arg0: i32) -> (i32, i32) {
    %c0_i32 = arith.constant 0 : i32
    %c0_i32_0 = arith.constant 0 : i32
    return %arg0, %c0_i32 : i32, i32
  }
}

</mosaic_0001>

<bundles_post_ra>
// kernel: tpu_custom_call.1
= control target key start
LH: loop header
LB: loop body
LE: loop exit
PB: predicated region body
PF: predicated region fallthrough
CT: control target
= control target key end

     0   :  { %8 = vsyncpa [#allocation3], 0  ;;  %s721_s0 = inlined_call_operand.hbm [shape: f32[16,32], index: 0, kind: input, shape index: {}]   ;;  %s722_s1 = inlined_call_operand.hbm [shape: f32[1,32], index: 1, kind: input, shape index: {}]   ;;  %s723_s2 = inlined_call_operand.vmem [shape: f32[1,32], index: 2, kind: input, shape index: {}]   ;;  %s724_s3 = inlined_call_operand.hbm [shape: f32[16,32], index: 3, kind: output, shape index: {}]  }
   0x1   :  { %10 = vsyncpa [#allocation3 + $0x1], 0 }
   0x2   :  { %11 = vsyncpa [#allocation6], 0 }
   0x3   :  { %12 = vsyncpa [#allocation4], 0 }
   0x4   :  { %14 = vsyncpa [#allocation4 + $0x1], 0  ;;  %s573_s12 = smov 0   ;;  %s575_s13 = smov 0  }
   0x5   :  { %s577_s14 = smov 0   ;;  %s579_s15 = smov 0  }
   0x6 LB: > { %s594_s16 = sadd.s32 4294967295, %s550_s15   ;;  %s343_s17 = sadd.s32 4294967294, %s550_s15   ;;  %s550_s15 = sphi %s579_s15, %s734_s15   ;;  %s546_s14 = sphi %s577_s14, %s733_s14   ;;  %s542_s13 = sphi %s575_s13, %s732_s13   ;;  %s538_s12 = sphi %s573_s12, %s731_s12  }
   0x7   : > { %p40_p0 = scmp.ne.s32.totalorder %s542_s13, %s538_s12  ;;  %p41_p1 = scmp.eq.s32.totalorder %s594_s16, 0 }
   0x8   : > { %p106_p2 = scmp.eq.s32.totalorder %s594_s16, 1  ;;  %p112_p3 = scmp.eq.s32.totalorder %s343_s17, 1 }
   0x9   : > { %p603_p4 = por %p41_p1, %p40_p0  ;;  %p344_p5 = scmp.ge.s32.totalorder %s550_s15, 1 }
   0xa   : > { %p608_p6 = por %p112_p3, %p40_p0  ;;  %p119_p7 = scmp.lt.s32.totalorder %s550_s15, 3 }
   0xb   : > { %s131_s22 = sshll.u32 %s722_s1, 4  ;;  %s552_s24 = smov [#allocation5]   ;;  %s132_s22 = int_to_ptr.hbm [resolvable:$true] %s131_s22 }
   0xc   : > { %p616_p8 = pnand %p344_p5, %p119_p7  ;;  %s133_s25 = sshll.u32 %s552_s24, 4  ;;  %s134_s25 = int_to_ptr.vmem [resolvable:$true] %s133_s25 }
   0xd   : > { %s626_s26 = sadd.s32 1, %s550_s15   ;;  %s27_s27 = sadd.s32 1, %s546_s14 }
   0xe   : > { %p365_p10 = pneg %p616_p8  ;;  %s24_s28 = ssub.s32 %s550_s15, %s626_s26 }
   0xf   : > { %p25_p12 = scmp.eq.s32.totalorder %s24_s28, 0  ;;  %p34_p13 = scmp.ne.s32.totalorder %s546_s14, %s542_s13 }
  0x10   : > { %p366_p11 = pnand %p365_p10, %p41_p1  ;;  %p35_p0 = scmp.eq.s32.totalorder %s550_s15, 0 }
  0x11   : > { %s635_s29 = scalar_select %p25_p12, %s546_s14, %s27_s27  }
  0x12   : > { %368 = dma.hbm_to_vmem [thread:$0]  (!%p366_p11), %s132_s22, 16, %s134_s25, [#allocation6]  }
  0x13   : > { %p639_p3 = por %p106_p2, %p34_p13  ;;  %p378_p5 = scmp.lt.s32.totalorder %s550_s15, 2 }
  0x14   : > { %s147_s4 = sand.u32 1, %s546_s14   ;;  %s348_s5 = sshll.u32 %s550_s15, 3 }
  0x15   : > { %p36_p7 = por %p35_p0, %p34_p13  ;;  %s347_s6 = sshll.u32 %s147_s4, 3 }
  0x16   : > { %s155_s9 = scalar_lea.hbm %s721_s0, %s348_s5  ;;  %s151_s11 = scalar_lea.vmem [#allocation2], %s347_s6 }
  0x17   : > { %s157_s10 = sshll.u32 %s155_s9, 4  ;;  %s159_s17 = sshll.u32 %s151_s11, 4  ;;  %s158_s10 = int_to_ptr.hbm [resolvable:$true] %s157_s10  ;;  %s160_s17 = int_to_ptr.vmem [resolvable:$true] %s159_s17 }
  0x18   : > { %p649_p10 = pnand %p378_p5, %p36_p7  ;;  %s148_s21 = scalar_lea.sflag [#allocation3], %s147_s4 }
  0x19   : > { %s450_s22 = sshra.s32 %s158_s10, 4  ;;  %s457_s28 = scalar_lea.hbm %s721_s0, 16  ;;  %s451_s22 = int_to_ptr.hbm [resolvable:$true] %s450_s22 }
  0x1a   : > { %s452_s24 = scalar_lea.hbm %s451_s22, 8  ;;  %p454_p11 = pneg %p649_p10 }
  0x1b   : > { %p453_p2 = scmp.ne.s32.totalorder %s451_s22, %s452_s24  ;;  %p458_p0 = scmp.lt.s32.totalorder %s451_s22, %s721_s0 }
  0x1c   : > { %p459_p5 = scmp.lt.s32.totalorder %s457_s28, %s452_s24 }
  0x1d   : > { %p455_p12 = pnand %p454_p11, %p453_p2 }
  0x1e   : > { %p460_p7 = por %p459_p5, %p458_p0 }
  0x1f   : > { %p456_p13 = pneg %p455_p12 }
  0x21   : > { %p461_p9 = pnand %p460_p7, %p456_p13 }
  0x23   : > { %464 = shalt.err (!%p461_p9)
}
  0x24   : > { %372 = dma.hbm_to_vmem [thread:$0]  (!%p649_p10), %s158_s10, 128, %s160_s17, %s148_s21  }
  0x25   : > { %168 = sbr.rel (%p616_p8) target bundleno = 338 (0x152), region = 32  ;;  %s666_s4 = sand.u32 (!%p616_p8), 1, %s542_s13  }
  0x26   : > { %s350_s7 = sshll.u32 (!%p616_p8), %s666_s4, 3  ;;  %s171_s8 = scalar_lea.sflag (!%p616_p8), [#allocation3], %s666_s4 }
  0x27   : > { %s174_s9 = scalar_lea.vmem (!%p616_p8), [#allocation2], %s350_s7 }
  0x2a   : > { %525 = dma.done.wait (%p603_p4), %s171_s8, 128  }
  0x2b   : > { %527 = vsyncadd (%p603_p4), %s171_s8, 4294967168 }
  0x2c   : > { %529 = dma.done.wait (%p41_p1), [#allocation6], 16  }
  0x2d   : > { %531 = vsyncadd (%p41_p1), [#allocation6], 4294967280  ;;  %vm204_vm0 = vcmask 261120   ;;  %v203_v0 = vld [vmem:[%s174_s9] sm:$0xff]  ;;  %v414_v16 = vld [vmem:[#allocation5] ss:$0 sm:$0xff] }
  0x2e   : > { %v205_v1 = vsel %vm204_vm0, %v203_v0, 0.0  ;;  %v415_v18 = vld [vmem:[%s723_s2] ss:$0 sm:$0xff]  ;;  %s354_s10 = sshll.u32 %s594_s16, 3  ;;  %s202_s21 = scalar_lea.vmem [#allocation7], %s350_s7 }
  0x2f   : > { %206 = vadd.xlane.f32.xlu0 %v205_v1  ;;  %s258_s20 = scalar_lea.hbm %s724_s3, %s354_s10  ;;  %s260_s22 = sshll.u32 %s202_s21, 4  ;;  %s261_s22 = int_to_ptr.vmem [resolvable:$true] %s260_s22 }
  0x30   : > { %s262_s24 = sshll.u32 %s258_s20, 4  ;;  %s248_s25 = scalar_lea.sflag [#allocation4], %s666_s4  ;;  %s263_s24 = int_to_ptr.hbm [resolvable:$true] %s262_s24 }
  0x31   : > { %s494_s27 = sshra.s32 %s263_s24, 4  ;;  %s500_s6 = scalar_lea.hbm %s724_s3, 16  ;;  %s495_s27 = int_to_ptr.hbm [resolvable:$true] %s494_s27 }
  0x32   : > { %s496_s16 = scalar_lea.hbm %s495_s27, 8  ;;  %p501_p9 = scmp.lt.s32.totalorder %s495_s27, %s724_s3 }
  0x33   : > { %p497_p1 = scmp.ne.s32.totalorder %s495_s27, %s496_s16  ;;  %p502_p10 = scmp.lt.s32.totalorder %s500_s6, %s496_s16 }
  0x35   : > { %p498_p4 = pnand %p497_p1, %p639_p3  ;;  %p503_p2 = por %p502_p10, %p501_p9 }
  0x37   : > { %p499_p8 = pneg %p498_p4 }
  0x39   : > { %p504_p11 = pnand %p503_p2, %p499_p8 }
  0xa2   : > { %v207_v2 = vpop.xlane.xlu0 %206 }
  0xa3   : > { %v208_v3 = vmul.f32 0.03125, %v207_v2 }
  0xa5   : > { %v209_v4 = vsub.f32 %v203_v0, %v208_v3 }
  0xa7   : > { %v210_v5 = vmul.f32 %v209_v4, %v209_v4 }
  0xa9   : > { %v211_v6 = vsel %vm204_vm0, %v210_v5, 0.0 }
  0xaa   : > { %212 = vadd.xlane.f32.xlu0 %v211_v6 }
 0x11d   : > { %v213_v7 = vpop.xlane.xlu0 %212 }
 0x11e   : > { %v214_v8 = vmul.f32 0.03125, %v213_v7 }
 0x120   : > { %v215_v9 = vadd.f32 1e-05, %v214_v8 }
 0x122   : > { %416 = vrsqrt.f32 %v215_v9  ;;  %vm222_vm2 = vweird.f32 %v215_v9 }
 0x128   : > { %v417_v10 = vpop.eup %416 }
 0x129   : > { %v217_v11 = vmul.f32 %v417_v10, %v215_v9  ;;  %vm223_vm1 = vweird.f32 %v417_v10 }
 0x12a   : > { %vm224_vm3 = vmor %vm222_vm2, %vm223_vm1 }
 0x12b   : > { %v218_v12 = vmul.f32 %v417_v10, %v217_v11 }
 0x12d   : > { %v219_v13 = vmul.f32 0.5, %v218_v12 }
 0x12f   : > { %v220_v14 = vsub.f32 1.5, %v219_v13 }
 0x131   : > { %v221_v15 = vmul.f32 %v417_v10, %v220_v14 }
 0x133   : > { %v225_v17 = vsel %vm224_vm3, %v417_v10, %v221_v15 }
 0x134   : > { %v226_v19 = vmul.f32 %v225_v17, %v209_v4 }
 0x136   : > { %v232_v20 = vmul.f32 %v414_v16, %v226_v19 }
 0x138   : > { %v236_v21 = vadd.f32 %v415_v18, %v232_v20 }
 0x13a   : > { %v238_v22 = vmul.f32 %v236_v21, %v236_v21  ;;  %v237_v28 = vmul.f32 0.5, %v236_v21 }
 0x13c   : > { %v239_v23 = vmul.f32 %v238_v22, %v236_v21 }
 0x13e   : > { %v240_v24 = vmul.f32 0.044715, %v239_v23 }
 0x140   : > { %v241_v25 = vadd.f32 %v240_v24, %v236_v21 }
 0x142   : > { %v242_v26 = vmul.f32 0.7978846, %v241_v25 }
 0x144   : > { %418 = vtanh.f32 %v242_v26 }
 0x14a   : > { %v419_v27 = vpop.eup %418 }
 0x14b   : > { %v244_v29 = vadd.f32 1.0, %v419_v27 }
 0x14d   : > { %v245_v30 = vmul.f32 %v244_v29, %v237_v28 }
 0x14f   : > { %246 = vst.msk [vmem:[%s202_s21] sm:$0xff] %vm204_vm0, %v245_v30 }
 0x150   : > { %507 = shalt.err (!%p504_p11)
}
 0x151   : > { %363 = dma.vmem_to_hbm [thread:$0]  (%p639_p3), %s261_s22, 128, %s263_s24, %s248_s25  }
 0x152 PF: > { %s274_s4 = sand.u32 1, %s538_s12   ;;  %p730_p12 = scmp.ge.s32.totalorder %s550_s15, 2 }
 0x153   : > { %s275_s9 = scalar_lea.sflag [#allocation4], %s274_s4 }
 0x154   : > { %p374_p13 = pnand %p730_p12, %p608_p6 }
 0x156   : > { %p375_p0 = pneg %p374_p13 }
 0x158   : > { %533 = dma.done.wait (%p375_p0), %s275_s9, 128  }
 0x159   : > { %535 = vsyncadd (%p375_p0), %s275_s9, 4294967168  ;;  %p17_p5 = scmp.ge.s32.totalorder %s626_s26, 4   ;;  %s731_s12 = smov %s542_s13 }
 0x15a   : > { %s732_s13 = smov %s546_s14  ;;  %s733_s14 = smov %s635_s29 }
 0x15b   : > { %s734_s15 = smov %s626_s26  ;;  %19 = sbr.rel (!%p17_p5) target bundleno = 6 (0x6), region = 81 }
 0x160   :  { %281 = vsyncpa [#allocation3], 1 }
 0x161   :  { %283 = vsyncpa [#allocation3 + $0x1], 1 }
 0x162   :  { %284 = vsyncpa [#allocation6], 1 }
 0x163   :  { %285 = vsyncpa [#allocation4], 1 }
 0x164   :  { %287 = vsyncpa [#allocation4 + $0x1], 1 }

</bundles_post_ra>
